<compile_context>
chip_gen: v6e
topology: v6e:2x2x1
jax: 0.10.0
libtpu: 0.0.40
codegen_flags: <defaults>
</compile_context>

<pallas_src>
import functools

import jax
import jax.numpy as jnp
from jax.experimental import pallas as pl
from jax.experimental.pallas import tpu as pltpu


def _nt_dot(a, b):
    """a @ b.T without materializing a transpose (contract last dims)."""
    return jax.lax.dot_general(
        a, b,
        dimension_numbers=(((1,), (1,)), ((), ())),
        preferred_element_type=jnp.float32,
    )


def _vae_slr_kernel(x_ref, wz_ref, s_ref, eps_ref, phi_s_ref,
                    z_ref, mu_z_ref, mu_x_ref):
    x = x_ref[...]            # (TB, d)
    eps = eps_ref[...]        # (TB, n)

    # Encoder: mu_z = x @ W_z.T            (TB, n)
    mu_z = _nt_dot(x, wz_ref[...])
    # Reparameterize: z = mu_z + eps @ S.T (TB, n)
    z = mu_z + _nt_dot(eps, s_ref[...])
    # Decoder: mu_x = z @ (Phi * w_x).T    (TB, d)   [w_x pre-folded into Phi]
    mu_x = _nt_dot(z, phi_s_ref[...])

    mu_z_ref[...] = mu_z.astype(mu_z_ref.dtype)
    z_ref[...] = z.astype(z_ref.dtype)
    mu_x_ref[...] = mu_x.astype(mu_x_ref.dtype)


def prepare_params(Phi, w_x):
    """One-time parameter prep: fold diag(w_x) into Phi (do NOT call per step)."""
    return (Phi * w_x.reshape(1, -1)).astype(jnp.float32)


def _pick_tile_b(B, d, n, *, budget_bytes=24 << 20):
    """Largest batch tile (multiple of 8) fitting a conservative VMEM budget.

    Budget is sized against v7x's 32 MiB default scoped VMEM (the tightest
    generation), accounting for double-buffered input/output tiles plus the
    resident parameters.
    """
    bpe = 4  # float32
    param_bytes = (n * d + n * n + d * n) * bpe
    per_row = ((d + n) + (d + 2 * n)) * bpe          # inputs + outputs per row
    avail = max(budget_bytes - param_bytes, 2 * 8 * per_row)
    tile = avail // (2 * per_row)                    # x2: double buffering
    tile = int(max(8, min(tile, 1024, max(B, 8))))
    return (tile // 8) * 8


@functools.partial(jax.jit, static_argnames=("tile_b",))
def vae_slr_forward(x, W_z, S, Phi_scaled, eps, *, tile_b=None):
    """Pallas-backed forward pass. Returns (z, mu_z, L, mu_x)."""
    B, d = x.shape
    n = W_z.shape[0]
    x = x.astype(jnp.float32)
    eps = eps.astype(jnp.float32)

    if tile_b is None:
        tile_b = _pick_tile_b(B, d, n)

    # Pad batch to a multiple of the tile; slice the outputs back at the end.
    n_tiles = pl.cdiv(B, tile_b)
    B_pad = n_tiles * tile_b
    if B_pad != B:
        pad = B_pad - B
        x = jnp.pad(x, ((0, pad), (0, 0)))
        eps = jnp.pad(eps, ((0, pad), (0, 0)))

    row_spec = lambda cols: pl.BlockSpec((tile_b, cols), lambda i: (i, 0))
    param_spec = lambda shape: pl.BlockSpec(shape, lambda i: (0, 0))

    flops = 2 * B_pad * (d * n + n * n + n * d)
    bytes_accessed = 4 * (
        B_pad * (d + n)                # x, eps in
        + n * d + n * n + d * n        # W_z, S, Phi_scaled in (resident)
        + B_pad * (2 * n + d)          # z, mu_z, mu_x out
    )

    z, mu_z, mu_x = pl.pallas_call(
        _vae_slr_kernel,
        out_shape=(
            jax.ShapeDtypeStruct((B_pad, n), jnp.float32),   # z
            jax.ShapeDtypeStruct((B_pad, n), jnp.float32),   # mu_z
            jax.ShapeDtypeStruct((B_pad, d), jnp.float32),   # mu_x
        ),
        grid=(n_tiles,),
        in_specs=[
            row_spec(d),               # x        (tile_b, d)
            param_spec((n, d)),        # W_z      resident
            param_spec((n, n)),        # S        resident
            row_spec(n),               # eps      (tile_b, n)
            param_spec((d, n)),        # Phi*w_x  resident
        ],
        out_specs=(row_spec(n), row_spec(n), row_spec(d)),
        compiler_params=pltpu.CompilerParams(
            dimension_semantics=("parallel",),
        ),
        cost_estimate=pl.CostEstimate(
            flops=flops, transcendentals=0, bytes_accessed=bytes_accessed),
    )(x, W_z.astype(jnp.float32), S.astype(jnp.float32), eps, Phi_scaled)

    if B_pad != B:
        z, mu_z, mu_x = z[:B], mu_z[:B], mu_x[:B]
    # L is simply the parameter S (passthrough, no compute).
    return z, mu_z, S, mu_x


if __name__ == "__main__":
    # Small, module-consistent shapes. B not a multiple of the tile to also
    # exercise the pad/slice path; tile_b=8 forces a multi-step batch grid.
    B, d, n = 20, 16, 8
    TILE_B = 8

    key = jax.random.PRNGKey(0)
    k_phi, k_wx, k_wz, k_s, k_x, k_eps = jax.random.split(key, 6)

    # Deterministic parameter init mirroring the PyTorch __init__ scales.
    Phi = jax.random.normal(k_phi, (d, n), dtype=jnp.float32)      # dictionary
    w_x = jax.random.normal(k_wx, (n,), dtype=jnp.float32) * 0.1
    W_z = jax.random.normal(k_wz, (n, d), dtype=jnp.float32) * 0.01
    S = jax.random.normal(k_s, (n, n), dtype=jnp.float32) * 0.01
    gamma = jnp.float32(1e-10)   # used only by elbo(), not forward()

    # Inputs: x and the reparameterization noise eps (explicit, deterministic).
    x = jax.random.normal(k_x, (B, d), dtype=jnp.float32)
    eps = jax.random.normal(k_eps, (B, n), dtype=jnp.float32)

    # One-time parameter preparation (fold w_x into Phi).
    Phi_scaled = prepare_params(Phi, w_x)

    z, mu_z, L, mu_x = vae_slr_forward(x, W_z, S, Phi_scaled, eps, tile_b=TILE_B)
    jax.block_until_ready((z, mu_z, L, mu_x))

    # Pure-JAX reference of the ORIGINAL (unfolded) module math.
    mu_z_ref = x @ W_z.T
    z_ref = mu_z_ref + eps @ S.T
    mu_x_ref = (z_ref * w_x) @ Phi.T
    assert z.shape == (B, n) and mu_z.shape == (B, n)
    assert L.shape == (n, n) and mu_x.shape == (B, d)
    assert jnp.allclose(mu_z, mu_z_ref, atol=1e-5), "mu_z mismatch"
    assert jnp.allclose(z, z_ref, atol=1e-5), "z mismatch"
    assert jnp.allclose(mu_x, mu_x_ref, atol=1e-4), "mu_x mismatch"
    assert jnp.allclose(L, S), "L passthrough mismatch"

    # Also exercise the auto tile-size path (single tile, no padding).
    z2, mu_z2, _, mu_x2 = vae_slr_forward(x, W_z, S, Phi_scaled, eps)
    jax.block_until_ready((z2, mu_z2, mu_x2))
    assert jnp.allclose(z2, z_ref, atol=1e-5)
    assert jnp.allclose(mu_x2, mu_x_ref, atol=1e-4)

    print("KERNEL_OK")
</pallas_src>

<mosaic_0001>
module attributes {stable_mosaic.version = 11 : i64} {
  func.func @_vae_slr_kernel(%arg0: i32, %arg1: memref<8x16xf32, #tpu.memory_space<vmem>>, %arg2: memref<8x16xf32, #tpu.memory_space<vmem>>, %arg3: memref<8x8xf32, #tpu.memory_space<vmem>>, %arg4: memref<8x8xf32, #tpu.memory_space<vmem>>, %arg5: memref<16x8xf32, #tpu.memory_space<vmem>>, %arg6: memref<8x8xf32, #tpu.memory_space<vmem>>, %arg7: memref<8x8xf32, #tpu.memory_space<vmem>>, %arg8: memref<8x16xf32, #tpu.memory_space<vmem>>) attributes {dimension_semantics = [#tpu.dimension_semantics<parallel>], iteration_bounds = array<i64: 3>, scalar_prefetch = 0 : i64, scratch_operands = 0 : i64, tpu.core_type = #tpu.core_type<tc>, window_params = [{transform_indices = @transform_0, window_bounds = array<i64: 8, 16>}, {pipeline_mode = #tpu.pipeline_mode<synchronous>, transform_indices = @transform_1, window_bounds = array<i64: 8, 16>}, {pipeline_mode = #tpu.pipeline_mode<synchronous>, transform_indices = @transform_2, window_bounds = array<i64: 8, 8>}, {transform_indices = @transform_3, window_bounds = array<i64: 8, 8>}, {pipeline_mode = #tpu.pipeline_mode<synchronous>, transform_indices = @transform_4, window_bounds = array<i64: 16, 8>}, {transform_indices = @transform_5, window_bounds = array<i64: 8, 8>}, {transform_indices = @transform_6, window_bounds = array<i64: 8, 8>}, {transform_indices = @transform_7, window_bounds = array<i64: 8, 16>}]} {
    %c0 = arith.constant 0 : index
    %c0_0 = arith.constant 0 : index
    %0 = vector.load %arg1[%c0, %c0_0] : memref<8x16xf32, #tpu.memory_space<vmem>>, vector<8x16xf32>
    %c0_1 = arith.constant 0 : index
    %c0_2 = arith.constant 0 : index
    %1 = vector.load %arg4[%c0_1, %c0_2] : memref<8x8xf32, #tpu.memory_space<vmem>>, vector<8x8xf32>
    %c0_3 = arith.constant 0 : index
    %c0_4 = arith.constant 0 : index
    %2 = vector.load %arg2[%c0_3, %c0_4] : memref<8x16xf32, #tpu.memory_space<vmem>>, vector<8x16xf32>
    %cst = arith.constant dense<0.000000e+00> : vector<8x8xf32>
    %3 = tpu.matmul %0, %2, %cst {dimension_numbers = #tpu.dot_dimension_numbers<[1], [1], [0], [0], [0, 0, 1, 0], [], []>} : vector<8x16xf32>, vector<8x16xf32>, vector<8x8xf32> -> vector<8x8xf32>
    %c0_5 = arith.constant 0 : index
    %c0_6 = arith.constant 0 : index
    %4 = vector.load %arg3[%c0_5, %c0_6] : memref<8x8xf32, #tpu.memory_space<vmem>>, vector<8x8xf32>
    %cst_7 = arith.constant dense<0.000000e+00> : vector<8x8xf32>
    %5 = tpu.matmul %1, %4, %cst_7 {dimension_numbers = #tpu.dot_dimension_numbers<[1], [1], [0], [0], [0, 0, 1, 0], [], []>} : vector<8x8xf32>, vector<8x8xf32>, vector<8x8xf32> -> vector<8x8xf32>
    %6 = arith.addf %3, %5 : vector<8x8xf32>
    %c0_8 = arith.constant 0 : index
    %c0_9 = arith.constant 0 : index
    %7 = vector.load %arg5[%c0_8, %c0_9] : memref<16x8xf32, #tpu.memory_space<vmem>>, vector<16x8xf32>
    %cst_10 = arith.constant dense<0.000000e+00> : vector<8x16xf32>
    %8 = tpu.matmul %6, %7, %cst_10 {dimension_numbers = #tpu.dot_dimension_numbers<[1], [1], [0], [0], [0, 0, 1, 0], [], []>} : vector<8x8xf32>, vector<16x8xf32>, vector<8x16xf32> -> vector<8x16xf32>
    %c0_11 = arith.constant 0 : index
    %c0_12 = arith.constant 0 : index
    %9 = vector.load %arg7[%c0_11, %c0_12] : memref<8x8xf32, #tpu.memory_space<vmem>>, vector<8x8xf32>
    tpu.vector_store %arg7[%c0_11, %c0_12], %3 {strides = array<i32>} : memref<8x8xf32, #tpu.memory_space<vmem>>, vector<8x8xf32>,
    %c0_13 = arith.constant 0 : index
    %c0_14 = arith.constant 0 : index
    %10 = vector.load %arg6[%c0_13, %c0_14] : memref<8x8xf32, #tpu.memory_space<vmem>>, vector<8x8xf32>
    tpu.vector_store %arg6[%c0_13, %c0_14], %6 {strides = array<i32>} : memref<8x8xf32, #tpu.memory_space<vmem>>, vector<8x8xf32>,
    %c0_15 = arith.constant 0 : index
    %c0_16 = arith.constant 0 : index
    %11 = vector.load %arg8[%c0_15, %c0_16] : memref<8x16xf32, #tpu.memory_space<vmem>>, vector<8x16xf32>
    tpu.vector_store %arg8[%c0_15, %c0_16], %8 {strides = array<i32>} : memref<8x16xf32, #tpu.memory_space<vmem>>, vector<8x16xf32>,
    return
  }
  func.func @transform_0(%arg0: i32) -> (i32, i32) {
    %c0_i32 = arith.constant 0 : i32
    %c0_i32_0 = arith.constant 0 : i32
    return %arg0, %c0_i32 : i32, i32
  }
  func.func @transform_1(%arg0: i32) -> (i32, i32) {
    %c0_i32 = arith.constant 0 : i32
    %c0_i32_0 = arith.constant 0 : i32
    %c0_i32_1 = arith.constant 0 : i32
    return %c0_i32, %c0_i32_0 : i32, i32
  }
  func.func @transform_2(%arg0: i32) -> (i32, i32) {
    %c0_i32 = arith.constant 0 : i32
    %c0_i32_0 = arith.constant 0 : i32
    %c0_i32_1 = arith.constant 0 : i32
    return %c0_i32, %c0_i32_0 : i32, i32
  }
  func.func @transform_3(%arg0: i32) -> (i32, i32) {
    %c0_i32 = arith.constant 0 : i32
    %c0_i32_0 = arith.constant 0 : i32
    return %arg0, %c0_i32 : i32, i32
  }
  func.func @transform_4(%arg0: i32) -> (i32, i32) {
    %c0_i32 = arith.constant 0 : i32
    %c0_i32_0 = arith.constant 0 : i32
    %c0_i32_1 = arith.constant 0 : i32
    return %c0_i32, %c0_i32_0 : i32, i32
  }
  func.func @transform_5(%arg0: i32) -> (i32, i32) {
    %c0_i32 = arith.constant 0 : i32
    %c0_i32_0 = arith.constant 0 : i32
    return %arg0, %c0_i32 : i32, i32
  }
  func.func @transform_6(%arg0: i32) -> (i32, i32) {
    %c0_i32 = arith.constant 0 : i32
    %c0_i32_0 = arith.constant 0 : i32
    return %arg0, %c0_i32 : i32, i32
  }
  func.func @transform_7(%arg0: i32) -> (i32, i32) {
    %c0_i32 = arith.constant 0 : i32
    %c0_i32_0 = arith.constant 0 : i32
    return %arg0, %c0_i32 : i32, i32
  }
}

</mosaic_0001>

<bundles_post_ra>
// kernel: vae_slr_forward.1
= control target key start
LH: loop header
LB: loop body
LE: loop exit
PB: predicated region body
PF: predicated region fallthrough
CT: control target
= control target key end

     0   :  { %s785_s24 = smov 0   ;;  %s833_s0 = inlined_call_operand.vmem [shape: f32[24,16], index: 0, kind: input, shape index: {}]   ;;  %s834_s1 = inlined_call_operand.vmem [shape: f32[8,16], index: 1, kind: input, shape index: {}]   ;;  %s835_s2 = inlined_call_operand.vmem [shape: f32[8,8], index: 2, kind: input, shape index: {}]   ;;  %s836_s3 = inlined_call_operand.vmem [shape: f32[24,8], index: 3, kind: input, shape index: {}]   ;;  %s837_s4 = inlined_call_operand.vmem [shape: f32[16,8], index: 4, kind: input, shape index: {}]   ;;  %s838_s5 = inlined_call_operand.vmem [shape: f32[24,8], index: 5, kind: output, shape index: {0}]   ;;  %s839_s6 = inlined_call_operand.vmem [shape: f32[24,8], index: 6, kind: output, shape index: {1}]   ;;  %s840_s7 = inlined_call_operand.vmem [shape: f32[24,16], index: 7, kind: output, shape index: {2}]  }
   0x1 LB: > { %s682_s25 = sadd.s32 4294967295, %s741_s24   ;;  %p686_p0 = scmp.ge.s32.totalorder %s741_s24, 1  ;;  %s741_s24 = sphi %s785_s24, %s18_s24  }
   0x2   : > { %p250_p1 = scmp.lt.s32.totalorder %s741_s24, 4 }
   0x4   : > { %p251_p2 = pnand %p686_p0, %p250_p1 }
   0x5   : > { %p292_p3 = scmp.lt.s32.totalorder (!%p251_p2), %s682_s25, 2 }
   0x6   : > { %254 = sbr.rel (%p251_p2) target bundleno = 410 (0x19a), region = 40 }
   0xb   : > { %v314_v0 = vld [vmem:[%s834_s1] sm:$0xff]  ;;  %vm315_vm0 = vcmask 130048   ;;  %v743_v1 = vmov 0.0   ;;  %vm744_vm1 = vmmov 0   ;;  %s842_s25 = smov (!%p292_p3, %s682_s25), 2  ;;  %vm393_vm2 = vcmask 64512  }
   0xc   : > { %708 = vmatprep.subr.mxu1 %v743_v1  ;;  %710 = vmatprep.mubr.msk.f32.mxu1 %vm744_vm1, %v743_v1  ;;  %s687_s28 = sshll.u32 %s842_s25, 3  ;;  %v392_v2 = vld [vmem:[%s835_s2] sm:$0xff]  ;;  %v472_v5 = vld [vmem:[%s837_s4 + $0x8] sm:$0xff] }
   0xd   : > { %709 = vmatpush3.xpose.msk.msra.mxu1 %vm315_vm0, %v314_v0  ;;  %718 = vmatprep.subr.mxu0 %v743_v1  ;;  %s295_s8 = scalar_lea.vmem %s833_s0, %s687_s28  ;;  %s299_s13 = scalar_lea.vmem %s836_s3, %s687_s28  ;;  %v471_v6 = vld [vmem:[%s837_s4] sm:$0xff] }
   0xe   : > { %713 = vmatprep.subr.mxu1 %v743_v1  ;;  %722 = vmatprep.mubr.msk.f32.mxu0 %vm744_vm1, %v743_v1  ;;  %v312_v3 = vld [vmem:[%s295_s8] sm:$0xff]  ;;  %s307_s20 = scalar_lea.vmem %s839_s6, %s687_s28  ;;  %s303_s23 = scalar_lea.vmem %s838_s5, %s687_s28 }
   0xf   : > { %v313_v4 = vld [vmem:[%s299_s13] sm:$0xff]  ;;  %719 = vmatpush3.xpose.msk.msra.mxu0 %vm393_vm2, %v472_v5  ;;  %s311_s27 = scalar_lea.vmem %s840_s7, %s687_s28 }
  0x10   : > { %711 = vmatmul.mubr.msk.f32.vlgmr.msra.gmra.mxu1 %vm315_vm0, %v312_v3  ;;  %720 = vmatprep.subr.mxu0 %v743_v1 }
  0x11   : > { %714 = vmatpush3.xpose.msk.msra.mxu1 %vm393_vm2, %v392_v2  ;;  %715 = vmatprep.mubr.msk.f32.mxu1 %vm744_vm1, %v743_v1 }
  0x13   : > { %721 = vmatpush3.xpose.msk.msra.mxu0 %vm393_vm2, %v471_v6 }
  0x14   : > { %716 = vmatmul.mubr.msk.f32.vlgmr.msra.gmra.mxu1 %vm393_vm2, %v313_v4 }
  0xd0   : > { %v388_v7 = vpop.f32.mrf.mxu1 }
  0xd1   : > { %552 = vst.msk [vmem:[%s307_s20] sm:$0xff] %vm393_vm2, %v388_v7 }
  0xd2   : > { %v712_v8 = vpop.f32.mrf.mxu1 }
  0xd4   : > { %v466_v9 = vpop.f32.mrf.mxu1 }
  0xd5   : > { %v470_v10 = vadd.f32 %v466_v9, %v388_v7 }
  0xd6   : > { %v717_v11 = vpop.f32.mrf.mxu1 }
  0xd7   : > { %553 = vst.msk [vmem:[%s303_s23] sm:$0xff] %vm393_vm2, %v470_v10  ;;  %723 = vmatmul.mubr.msk.f32.vlgmr.msra.gmra.mxu0 %vm393_vm2, %v470_v10 }
 0x197   : > { %v548_v12 = vpop.f32.mrf.mxu0 }
 0x198   : > { %554 = vst.msk [vmem:[%s311_s27] sm:$0xff] %vm315_vm0, %v548_v12 }
 0x199   : > { %v724_v13 = vpop.f32.mrf.mxu0 }
 0x19a PF: > { %s18_s24 = sadd.s32 1, %s741_s24  }
 0x19b   : > { %p15_p4 = scmp.ge.s32.totalorder %s18_s24, 5  }
 0x19d   :  { %17 = sbr.rel (!%p15_p4) target bundleno = 1 (0x1), region = 97 }

</bundles_post_ra>
